<compile_context>
chip_gen: v7x
topology: tpu7x:2x2x1
jax: 0.10.0
libtpu: 0.0.40
codegen_flags: <defaults>
</compile_context>

<pallas_src>
import math

import jax
import jax.numpy as jnp
from jax.experimental import pallas as pl
from jax.experimental.pallas import tpu as pltpu


def dqn_kernel(x_ref, w1_ref, b1_ref, w2_ref, b2_ref, w3_ref, b3_ref, o_ref):
    # x tile: [TM, K] f32; weights/biases f32; output f32 [TM, out_size].
    x = x_ref[...]
    h1 = jnp.dot(x, w1_ref[...], preferred_element_type=jnp.float32) + b1_ref[...]
    h1 = jnp.maximum(h1, 0.0)
    h2 = jnp.dot(h1, w2_ref[...], preferred_element_type=jnp.float32) + b2_ref[...]
    h2 = jnp.maximum(h2, 0.0)
    o = jnp.dot(h2, w3_ref[...], preferred_element_type=jnp.float32) + b3_ref[...]
    o_ref[...] = o.astype(o_ref.dtype)


def _cdiv(a, b):
    return -(-a // b)


def _round_up(a, m):
    return _cdiv(a, m) * m


def _choose_tm(batch, tm_max=1024):
    """Batch-tile rows: fat tiles for large batches, >=2 tiles whenever the
    batch is big enough (v7x megacore), minimal row padding otherwise."""
    if batch <= 32:
        return _round_up(batch, 8)          # single small tile
    n_tiles = max(2, _cdiv(batch, tm_max))  # >=2 grid steps for megacore
    return _round_up(_cdiv(batch, n_tiles), 16)


def dqn_forward(x, params, *, tm_max=1024):
    """x: [B, input_size] float32. params: dict of w1,b1,w2,b2,w3,b3 (f32)."""
    B, K = x.shape
    out_size = params["w3"].shape[1]

    TM = _choose_tm(B, tm_max)
    grid_m = _cdiv(B, TM)
    B_pad = grid_m * TM

    x_in = x
    if B_pad != B:  # pad batch rows only when needed (no dtype pre-pass)
        x_in = jnp.zeros((B_pad, K), x.dtype).at[:B].set(x)

    def resident(arr):
        # Whole array resident in VMEM every grid step (constant block index).
        return pl.BlockSpec(arr.shape, lambda i: (0,) * arr.ndim)

    out = pl.pallas_call(
        dqn_kernel,
        out_shape=jax.ShapeDtypeStruct((B_pad, out_size), jnp.float32),
        grid_spec=pltpu.PrefetchScalarGridSpec(
            num_scalar_prefetch=0,
            grid=(grid_m,),
            in_specs=[
                pl.BlockSpec((TM, K), lambda i: (i, 0)),   # x batch tile
                resident(params["w1"]), resident(params["b1"]),
                resident(params["w2"]), resident(params["b2"]),
                resident(params["w3"]), resident(params["b3"]),
            ],
            out_specs=pl.BlockSpec((TM, out_size), lambda i: (i, 0)),
        ),
        compiler_params=pltpu.CompilerParams(
            dimension_semantics=("parallel",),  # v7x: shard batch across 2 TCs
        ),
    )(x_in, params["w1"], params["b1"], params["w2"], params["b2"],
      params["w3"], params["b3"])

    return out if B_pad == B else out[:B]


def init_linear(key, fan_in, fan_out):
    """Deterministic init mirroring nn.Linear's U(-1/sqrt(fan_in), 1/sqrt(fan_in)).

    Returns W as [fan_in, fan_out] and b as [1, fan_out].
    """
    kw, kb = jax.random.split(key)
    bound = 1.0 / math.sqrt(fan_in)
    w = jax.random.uniform(kw, (fan_in, fan_out), jnp.float32, -bound, bound)
    b = jax.random.uniform(kb, (1, fan_out), jnp.float32, -bound, bound)
    return w, b


def make_params(key, input_size, output_size):
    k1, k2, k3 = jax.random.split(key, 3)
    w1, b1 = init_linear(k1, input_size, 128)
    w2, b2 = init_linear(k2, 128, 64)
    w3, b3 = init_linear(k3, 64, output_size)
    return {"w1": w1, "b1": b1, "w2": w2, "b2": b2, "w3": w3, "b3": b3}


def dqn_reference(x, p):
    # Pure f32 reference matching the PyTorch forward pass.
    hp = jax.lax.Precision.HIGHEST
    h1 = jnp.maximum(jnp.dot(x, p["w1"], precision=hp) + p["b1"], 0.0)
    h2 = jnp.maximum(jnp.dot(h1, p["w2"], precision=hp) + p["b2"], 0.0)
    return jnp.dot(h2, p["w3"], precision=hp) + p["b3"]


if __name__ == "__main__":
    key = jax.random.PRNGKey(0)
    k_x, k_p, k_x2 = jax.random.split(key, 3)

    batch = 8
    input_size = 32   # number of test nodes
    output_size = 16  # number of possible actions

    params = make_params(k_p, input_size, output_size)

    # Small-batch check (single grid step, TM = 8, no padding).
    x = jax.random.normal(k_x, (batch, input_size), jnp.float32)
    out = dqn_forward(x, params)
    jax.block_until_ready(out)
    ref = dqn_reference(x, params)
    assert out.shape == (batch, output_size)
    assert jnp.allclose(out, ref, atol=2e-3, rtol=2e-3)

    # Multi-tile grid check (B=300 -> TM=160, grid_m=2): exercises batch
    # padding (20 rows) and the two-tile megacore split.
    x2 = jax.random.normal(k_x2, (300, input_size), jnp.float32)
    out2 = dqn_forward(x2, params)
    jax.block_until_ready(out2)
    ref2 = dqn_reference(x2, params)
    assert out2.shape == (300, output_size)
    assert jnp.allclose(out2, ref2, atol=2e-3, rtol=2e-3)

    print("KERNEL_OK")
</pallas_src>

<mosaic_0001>
module attributes {stable_mosaic.version = 11 : i64} {
  func.func @dqn_kernel(%arg0: i32, %arg1: memref<8x32xf32, #tpu.memory_space<vmem>>, %arg2: memref<32x128xf32, #tpu.memory_space<vmem>>, %arg3: memref<1x128xf32, #tpu.memory_space<vmem>>, %arg4: memref<128x64xf32, #tpu.memory_space<vmem>>, %arg5: memref<1x64xf32, #tpu.memory_space<vmem>>, %arg6: memref<64x16xf32, #tpu.memory_space<vmem>>, %arg7: memref<1x16xf32, #tpu.memory_space<vmem>>, %arg8: memref<8x16xf32, #tpu.memory_space<vmem>>) attributes {dimension_semantics = [#tpu.dimension_semantics<parallel>], iteration_bounds = array<i64: 1>, scalar_prefetch = 0 : i64, scratch_operands = 0 : i64, tpu.core_type = #tpu.core_type<tc>, window_params = [{transform_indices = @transform_0, window_bounds = array<i64: 8, 32>}, {pipeline_mode = #tpu.pipeline_mode<synchronous>, transform_indices = @transform_1, window_bounds = array<i64: 32, 128>}, {pipeline_mode = #tpu.pipeline_mode<synchronous>, transform_indices = @transform_2, window_bounds = array<i64: 1, 128>}, {pipeline_mode = #tpu.pipeline_mode<synchronous>, transform_indices = @transform_3, window_bounds = array<i64: 128, 64>}, {pipeline_mode = #tpu.pipeline_mode<synchronous>, transform_indices = @transform_4, window_bounds = array<i64: 1, 64>}, {pipeline_mode = #tpu.pipeline_mode<synchronous>, transform_indices = @transform_5, window_bounds = array<i64: 64, 16>}, {pipeline_mode = #tpu.pipeline_mode<synchronous>, transform_indices = @transform_6, window_bounds = array<i64: 1, 16>}, {transform_indices = @transform_7, window_bounds = array<i64: 8, 16>}]} {
    %c0 = arith.constant 0 : index
    %c0_0 = arith.constant 0 : index
    %0 = vector.load %arg1[%c0, %c0_0] : memref<8x32xf32, #tpu.memory_space<vmem>>, vector<8x32xf32>
    %c0_1 = arith.constant 0 : index
    %c0_2 = arith.constant 0 : index
    %1 = vector.load %arg2[%c0_1, %c0_2] : memref<32x128xf32, #tpu.memory_space<vmem>>, vector<32x128xf32>
    %cst = arith.constant dense<0.000000e+00> : vector<8x128xf32>
    %2 = tpu.matmul %0, %1, %cst {dimension_numbers = #tpu.dot_dimension_numbers<[1], [0], [0], [1], [0, 0, 1, 1], [], []>} : vector<8x32xf32>, vector<32x128xf32>, vector<8x128xf32> -> vector<8x128xf32>
    %c0_3 = arith.constant 0 : index
    %c0_4 = arith.constant 0 : index
    %3 = vector.load %arg3[%c0_3, %c0_4] : memref<1x128xf32, #tpu.memory_space<vmem>>, vector<1x128xf32>
    %4 = vector.broadcast %3 : vector<1x128xf32> to vector<8x128xf32>
    %5 = arith.addf %2, %4 : vector<8x128xf32>
    %cst_5 = arith.constant 0.000000e+00 : f32
    %6 = vector.broadcast %cst_5 : f32 to vector<8x128xf32>
    %7 = arith.maximumf %5, %6 : vector<8x128xf32>
    %c0_6 = arith.constant 0 : index
    %c0_7 = arith.constant 0 : index
    %8 = vector.load %arg4[%c0_6, %c0_7] : memref<128x64xf32, #tpu.memory_space<vmem>>, vector<128x64xf32>
    %cst_8 = arith.constant dense<0.000000e+00> : vector<8x64xf32>
    %9 = tpu.matmul %7, %8, %cst_8 {dimension_numbers = #tpu.dot_dimension_numbers<[1], [0], [0], [1], [0, 0, 1, 1], [], []>} : vector<8x128xf32>, vector<128x64xf32>, vector<8x64xf32> -> vector<8x64xf32>
    %c0_9 = arith.constant 0 : index
    %c0_10 = arith.constant 0 : index
    %10 = vector.load %arg5[%c0_9, %c0_10] : memref<1x64xf32, #tpu.memory_space<vmem>>, vector<1x64xf32>
    %11 = vector.broadcast %10 : vector<1x64xf32> to vector<8x64xf32>
    %12 = arith.addf %9, %11 : vector<8x64xf32>
    %cst_11 = arith.constant 0.000000e+00 : f32
    %13 = vector.broadcast %cst_11 : f32 to vector<8x64xf32>
    %14 = arith.maximumf %12, %13 : vector<8x64xf32>
    %c0_12 = arith.constant 0 : index
    %c0_13 = arith.constant 0 : index
    %15 = vector.load %arg6[%c0_12, %c0_13] : memref<64x16xf32, #tpu.memory_space<vmem>>, vector<64x16xf32>
    %cst_14 = arith.constant dense<0.000000e+00> : vector<8x16xf32>
    %16 = tpu.matmul %14, %15, %cst_14 {dimension_numbers = #tpu.dot_dimension_numbers<[1], [0], [0], [1], [0, 0, 1, 1], [], []>} : vector<8x64xf32>, vector<64x16xf32>, vector<8x16xf32> -> vector<8x16xf32>
    %c0_15 = arith.constant 0 : index
    %c0_16 = arith.constant 0 : index
    %17 = vector.load %arg7[%c0_15, %c0_16] : memref<1x16xf32, #tpu.memory_space<vmem>>, vector<1x16xf32>
    %18 = vector.broadcast %17 : vector<1x16xf32> to vector<8x16xf32>
    %19 = arith.addf %16, %18 : vector<8x16xf32>
    %c0_17 = arith.constant 0 : index
    %c0_18 = arith.constant 0 : index
    %20 = vector.load %arg8[%c0_17, %c0_18] : memref<8x16xf32, #tpu.memory_space<vmem>>, vector<8x16xf32>
    tpu.vector_store %arg8[%c0_17, %c0_18], %19 {strides = array<i32>} : memref<8x16xf32, #tpu.memory_space<vmem>>, vector<8x16xf32>,
    return
  }
  func.func @transform_0(%arg0: i32) -> (i32, i32) {
    %c0_i32 = arith.constant 0 : i32
    %c0_i32_0 = arith.constant 0 : i32
    return %arg0, %c0_i32 : i32, i32
  }
  func.func @transform_1(%arg0: i32) -> (i32, i32) {
    %c0_i32 = arith.constant 0 : i32
    %c0_i32_0 = arith.constant 0 : i32
    %c0_i32_1 = arith.constant 0 : i32
    return %c0_i32, %c0_i32_0 : i32, i32
  }
  func.func @transform_2(%arg0: i32) -> (i32, i32) {
    %c0_i32 = arith.constant 0 : i32
    %c0_i32_0 = arith.constant 0 : i32
    %c0_i32_1 = arith.constant 0 : i32
    return %c0_i32, %c0_i32_0 : i32, i32
  }
  func.func @transform_3(%arg0: i32) -> (i32, i32) {
    %c0_i32 = arith.constant 0 : i32
    %c0_i32_0 = arith.constant 0 : i32
    %c0_i32_1 = arith.constant 0 : i32
    return %c0_i32, %c0_i32_0 : i32, i32
  }
  func.func @transform_4(%arg0: i32) -> (i32, i32) {
    %c0_i32 = arith.constant 0 : i32
    %c0_i32_0 = arith.constant 0 : i32
    %c0_i32_1 = arith.constant 0 : i32
    return %c0_i32, %c0_i32_0 : i32, i32
  }
  func.func @transform_5(%arg0: i32) -> (i32, i32) {
    %c0_i32 = arith.constant 0 : i32
    %c0_i32_0 = arith.constant 0 : i32
    %c0_i32_1 = arith.constant 0 : i32
    return %c0_i32, %c0_i32_0 : i32, i32
  }
  func.func @transform_6(%arg0: i32) -> (i32, i32) {
    %c0_i32 = arith.constant 0 : i32
    %c0_i32_0 = arith.constant 0 : i32
    %c0_i32_1 = arith.constant 0 : i32
    return %c0_i32, %c0_i32_0 : i32, i32
  }
  func.func @transform_7(%arg0: i32) -> (i32, i32) {
    %c0_i32 = arith.constant 0 : i32
    %c0_i32_0 = arith.constant 0 : i32
    return %arg0, %c0_i32 : i32, i32
  }
}

</mosaic_0001>

<bundles_post_ra>
// kernel: tpu_custom_call.1
= control target key start
LH: loop header
LB: loop body
LE: loop exit
PB: predicated region body
PF: predicated region fallthrough
CT: control target
= control target key end

     0   :  { %v484_v3 = vmov 0.0|0.0   ;;  %vm485_vm0 = vmmov 0   ;;  %v486_v6 = vmov 0.0   ;;  %s653_s0 = inlined_call_operand.vmem [shape: f32[8,32], index: 0, kind: input, shape index: {}]   ;;  %s654_s1 = inlined_call_operand.vmem [shape: f32[32,128], index: 1, kind: input, shape index: {}]   ;;  %s655_s2 = inlined_call_operand.vmem [shape: f32[1,128], index: 2, kind: input, shape index: {}]   ;;  %s656_s3 = inlined_call_operand.vmem [shape: f32[128,64], index: 3, kind: input, shape index: {}]   ;;  %s657_s4 = inlined_call_operand.vmem [shape: f32[1,64], index: 4, kind: input, shape index: {}]   ;;  %s658_s5 = inlined_call_operand.vmem [shape: f32[64,16], index: 5, kind: input, shape index: {}]   ;;  %s659_s6 = inlined_call_operand.vmem [shape: f32[1,16], index: 6, kind: input, shape index: {}]   ;;  %s660_s7 = inlined_call_operand.hbm [shape: f32[8,16], index: 7, kind: output, shape index: {}]  }
   0x1   :  { %v28_v0 = vld [vmem:[%s654_s1] sm:$0xff]  ;;  %v29_v1 = vld [vmem:[%s654_s1 + $0x8] sm:$0xff]  ;;  %v30_v2 = vld [vmem:[%s654_s1 + $0x10] sm:$0xff]  ;;  %414 = vmatprep.subr.bf16.mxu0 %v484_v3  ;;  %357 = vmatprep.mubr.msk.f32.mxu0 %vm485_vm0, %v486_v6 }
   0x2   :  { %v415_v4 = vpack.c.bf16 %v29_v1, %v28_v0  ;;  %v31_v5 = vld [vmem:[%s654_s1 + $0x18] sm:$0xff]  ;;  %v114_v7 = vld [vmem:[%s656_s3] sm:$0xff]  ;;  %420 = vmatprep.subr.bf16.mxu1 %v484_v3  ;;  %v115_v8 = vld [vmem:[%s656_s3 + $0x8] sm:$0xff]  ;;  %392 = vmatprep.mubr.msk.f32.mxu1 %vm485_vm0, %v486_v6 }
   0x3   :  { %v116_v9 = vld [vmem:[%s656_s3 + $0x10] sm:$0xff]  ;;  %v117_v10 = vld [vmem:[%s656_s3 + $0x18] sm:$0xff]  ;;  %v418_v11 = vpack.c.bf16 %v31_v5, %v30_v2  ;;  %v421_v12 = vpack.c.bf16 %v115_v8, %v114_v7  ;;  %v118_v14 = vld [vmem:[%s656_s3 + $0x20] sm:$0xff] }
   0x4   :  { %416 = vmatpush3.bf16.msra.mxu0 %v415_v4  ;;  %v424_v13 = vpack.c.bf16 %v117_v10, %v116_v9  ;;  %v119_v15 = vld [vmem:[%s656_s3 + $0x28] sm:$0xff] }
   0x5   :  { %417 = vmatprep.subr.bf16.mxu0 %v484_v3  ;;  %422 = vmatpush3.bf16.msra.mxu1 %v421_v12 }
   0x6   :  { %423 = vmatprep.subr.bf16.mxu1 %v484_v3 }
   0x7   :  { %12 = vsyncpa [#allocation3], 0  ;;  %v27_v16 = vld [vmem:[%s653_s0] sm:$0xff]  ;;  %vm39_vm1 = vcmask 261120   ;;  %v427_v17 = vpack.c.bf16 %v119_v15, %v118_v14  ;;  %v120_v18 = vld [vmem:[%s656_s3 + $0x30] sm:$0xff]  ;;  %vm223_vm2 = vcmask 523264  }
   0x8   :  { %419 = vmatpush3.bf16.msra.mxu0 %v418_v11  ;;  %v121_v19 = vld [vmem:[%s656_s3 + $0x38] sm:$0xff]  ;;  %v122_v21 = vld [vmem:[%s656_s3 + $0x40] sm:$0xff]  ;;  %v123_v22 = vld [vmem:[%s656_s3 + $0x48] sm:$0xff]  ;;  %s487_s13 = smov [#allocation2]   ;;  %vm297_vm3 = vcmask 130048  }
   0x9   :  { %444 = vmatprep.subr.bf16.mxu0 %v484_v3  ;;  %425 = vmatpush3.bf16.msra.mxu1 %v424_v13  ;;  %v430_v20 = vpack.c.bf16 %v121_v19, %v120_v18  ;;  %v433_v23 = vpack.c.bf16 %v123_v22, %v122_v21  ;;  %v124_v24 = vld [vmem:[%s656_s3 + $0x50] sm:$0xff]  ;;  %v125_v25 = vld [vmem:[%s656_s3 + $0x58] sm:$0xff]  ;;  %v126_v27 = vld [vmem:[%s656_s3 + $0x60] sm:$0xff]  ;;  %s305_s14 = sshll.u32 %s487_s13, 4  ;;  %s306_s14 = int_to_ptr.vmem [resolvable:$true] %s305_s14 }
   0xa   :  { %426 = vmatprep.subr.bf16.mxu1 %v484_v3  ;;  %v436_v26 = vpack.c.bf16 %v125_v25, %v124_v24  ;;  %v127_v28 = vld [vmem:[%s656_s3 + $0x68] sm:$0xff]  ;;  %v128_v30 = vld [vmem:[%s656_s3 + $0x70] sm:$0xff]  ;;  %v129_v31 = vld [vmem:[%s656_s3 + $0x78] sm:$0xff]  ;;  %p465_p1 = scmp.lt.s32.totalorder %s306_s14, %s306_s14 }
   0xb   :  { %358 = vmatmul.mubr.msk.f32.vlgmr.msra.gmra.mrb[0].mxu0 %vm39_vm1, %v27_v16  ;;  %v439_v29 = vpack.c.bf16 %v127_v28, %v126_v27  ;;  %v442_v32 = vpack.c.bf16 %v129_v31, %v128_v30  ;;  %v208_v33 = vld [vmem:[%s658_s5] sm:$0xff]  ;;  %v209_v34 = vld [vmem:[%s658_s5 + $0x8] sm:$0xff]  ;;  %v210_v35 = vld [vmem:[%s658_s5 + $0x10] sm:$0xff] }
   0xc   :  { %411 = vmatprep.mubr.msk.f32.mxu0 %vm485_vm0, %v486_v6  ;;  %v445_v36 = vpack.c.bf16 %v209_v34, %v208_v33  ;;  %v211_v37 = vld [vmem:[%s658_s5 + $0x18] sm:$0xff]  ;;  %v212_v39 = vld [vmem:[%s658_s5 + $0x20] sm:$0xff]  ;;  %v213_v40 = vld [vmem:[%s658_s5 + $0x28] sm:$0xff] }
   0xd   :  { %428 = vmatpush3.bf16.msra.mxu1 %v427_v17  ;;  %v448_v38 = vpack.c.bf16 %v211_v37, %v210_v35  ;;  %v451_v41 = vpack.c.bf16 %v213_v40, %v212_v39  ;;  %v313_v42 = vld [vmem:[%s655_s2] ss:$0 sm:$0xff]  ;;  %v214_v47 = vld [vmem:[%s658_s5 + $0x30] sm:$0xff]  ;;  %v215_v48 = vld [vmem:[%s658_s5 + $0x38] sm:$0xff]  ;;  %s460_s5 = scalar_lea.vmem %s306_s14, 128 }
   0xe   :  { %429 = vmatprep.subr.bf16.mxu1 %v484_v3  ;;  %446 = vmatpush3.bf16.msra.mxu0 %v445_v36  ;;  %v454_v49 = vpack.c.bf16 %v215_v48, %v214_v47  ;;  %v315_v50 = vld [vmem:[%s657_s4] ss:$0 sm:$0xff]  ;;  %p461_p0 = scmp.ne.s32.totalorder %s306_s14, %s460_s5  ;;  %p466_p2 = scmp.lt.s32.totalorder %s460_s5, %s460_s5 }
   0xf   :  { %447 = vmatprep.subr.bf16.mxu0 %v484_v3  ;;  %v316_v55 = vld [vmem:[%s659_s6] ss:$0 sm:$0xff] }
  0x10   :  { %p467_p3 = por %p466_p2, %p465_p1 }
  0x11   :  { %431 = vmatpush3.bf16.msra.mxu1 %v430_v20 }
  0x12   :  { %432 = vmatprep.subr.bf16.mxu1 %v484_v3  ;;  %449 = vmatpush3.bf16.msra.mxu0 %v448_v38  ;;  %p468_p4 = pnand %p467_p3, %p461_p0 }
  0x13   :  { %450 = vmatprep.subr.bf16.mxu0 %v484_v3 }
  0x15   :  { %434 = vmatpush3.bf16.msra.mxu1 %v433_v23 }
  0x16   :  { %435 = vmatprep.subr.bf16.mxu1 %v484_v3  ;;  %452 = vmatpush3.bf16.msra.mxu0 %v451_v41 }
  0x17   :  { %453 = vmatprep.subr.bf16.mxu0 %v484_v3 }
  0x19   :  { %437 = vmatpush3.bf16.msra.mxu1 %v436_v26 }
  0x1a   :  { %438 = vmatprep.subr.bf16.mxu1 %v484_v3  ;;  %455 = vmatpush3.bf16.msra.mxu0 %v454_v49 }
  0x1d   :  { %440 = vmatpush3.bf16.msra.mxu1 %v439_v29 }
  0x1e   :  { %441 = vmatprep.subr.bf16.mxu1 %v484_v3 }
  0x21   :  { %443 = vmatpush3.bf16.msra.mxu1 %v442_v32 }
  0xde   :  { %v109_v43 = vpop.f32.mrb[0].mxu0 }
  0xdf   :  { %v110_v44 = vadd.f32 %v313_v42, %v109_v43  ;;  %v359_v45 = vpop.f32.mrb[1].mxu0 }
  0xe1   :  { %v113_v46 = vmax.f32 %v110_v44, 0.0 }
  0xe3   :  { %393 = vmatmul.mubr.f32.vlgmr.msra.gmra.mrb[0].mxu1 %v113_v46 }
 0x1b6   :  { %v203_v51 = vpop.f32.mrb[0].mxu1 }
 0x1b7   :  { %v204_v52 = vadd.f32 %v315_v50, %v203_v51  ;;  %v394_v53 = vpop.f32.mrb[1].mxu1 }
 0x1b9   :  { %v207_v54 = vmax.f32 %v204_v52, 0.0 }
 0x1bb   :  { %412 = vmatmul.mubr.msk.f32.vlgmr.msra.gmra.mrb[2].mxu0 %vm223_vm2, %v207_v54 }
 0x28e   :  { %v293_v56 = vpop.f32.mrb[2].mxu0 }
 0x28f   :  { %v294_v57 = vadd.f32 %v316_v55, %v293_v56  ;;  %v413_v58 = vpop.f32.mrb[3].mxu0 }
 0x291   :  { %298 = vst.msk [vmem:[#allocation2] sm:$0xff] %vm297_vm3, %v294_v57 }
 0x292   :  { %471 = shalt.err (!%p468_p4)
}
 0x293   :  { %s472_s1 = scalar_lea.hbm %s660_s7, 128 }
 0x294   :  { %p473_p5 = scmp.ne.s32.totalorder %s660_s7, %s472_s1  ;;  %p476_p6 = scmp.lt.u32.totalorder %s472_s1, %s660_s7 }
 0x296   :  { %p478_p7 = pnand %p476_p6, %p473_p5 }
 0x298   :  { %481 = shalt.err (!%p478_p7)
}
 0x299   :  { %308 = dma.vmem_to_hbm [thread:$0]  %s306_s14, 128, %s660_s7, [#allocation3]  }
 0x29a   :  { %482 = dma.done.wait [#allocation3], 128  }
 0x29b   :  { %483 = vsyncadd [#allocation3], 4294967168 }
 0x29c   :  { %312 = vsyncpa [#allocation3], 1 }

</bundles_post_ra>
